<compile_context>
chip_gen: v7x
topology: tpu7x:2x2x1
jax: 0.10.0
libtpu: 0.0.40
codegen_flags: <defaults>
</compile_context>

<pallas_src>
import functools

import jax
import jax.numpy as jnp
from jax.experimental import pallas as pl
from jax.experimental.pallas import tpu as pltpu


def _make_bce_kernel(n_total, tn, has_mask, lane_acc):
    """Build the kernel body (closure over static tiling parameters)."""

    def kernel(*refs):
        if has_mask:
            x_ref, t_ref, m_ref, o_ref, acc_ref = refs
        else:
            x_ref, t_ref, o_ref, acc_ref = refs
            m_ref = None

        n_idx = pl.program_id(1)

        @pl.when(n_idx == 0)
        def _init():
            acc_ref[...] = jnp.zeros_like(acc_ref)

        x = x_ref[...].astype(jnp.float32)
        t = t_ref[...].astype(jnp.float32)

        # Numerically stable BCE-with-logits (torch formulation):
        #   loss = max(x, 0) - x*t + log(1 + exp(-|x|))
        loss = jnp.maximum(x, 0.0) - x * t + jnp.log1p(jnp.exp(-jnp.abs(x)))

        if has_mask:
            # mask kept narrow in HBM; widen to f32 only in VMEM.
            loss = loss * m_ref[...].astype(jnp.float32)

        if n_total % tn != 0:
            # Ragged last N tile: zero out padded lanes (select, NaN-safe).
            col = jax.lax.broadcasted_iota(jnp.int32, loss.shape, 1)
            remaining = n_total - n_idx * tn
            loss = jnp.where(col < remaining, loss, 0.0)

        if lane_acc:
            # Defer the cross-lane (XLU) reduction: fold the TN lanes into a
            # lane-aligned (TB, 128) partial sum using cheap VPU adds.
            acc = acc_ref[...]
            for c in range(tn // 128):
                acc = acc + loss[:, c * 128:(c + 1) * 128]
            acc_ref[...] = acc
        else:
            # Small-N fallback (single N step): one reduce is fine.
            acc_ref[...] += jnp.sum(loss, axis=1, keepdims=True)

        @pl.when(n_idx == pl.num_programs(1) - 1)
        def _finalize():
            # One cross-lane reduce + one store per B-tile.
            row_sum = jnp.sum(acc_ref[...], axis=1, keepdims=True)
            o_ref[...] = (row_sum * (1.0 / n_total)).astype(o_ref.dtype)

    return kernel


def _choose_tiles(B, N):
    # v7x-safe budget: 3 inputs x 2 pipeline buffers x (256*1024*4B) ~= 6 MiB.
    TB = B if B <= 256 else 256        # multiple of 8/16/32 when tiled
    TN = N if N <= 1024 else 1024      # multiple of 128 when tiled
    return TB, TN


@functools.partial(jax.jit, static_argnames=("has_mask",))
def _sigmoid_bce_call(inputs, target, mask, *, has_mask):
    B, N = inputs.shape
    TB, TN = _choose_tiles(B, N)
    lane_acc = (TN % 128 == 0)
    lanes = 128 if lane_acc else 1

    grid = (pl.cdiv(B, TB), pl.cdiv(N, TN))

    tile_spec = lambda: pl.BlockSpec((TB, TN), lambda b, n: (b, n))
    in_specs = [tile_spec(), tile_spec()]
    args = [inputs, target]
    if has_mask:
        in_specs.append(tile_spec())
        args.append(mask)

    kernel = _make_bce_kernel(N, TN, has_mask, lane_acc)

    out = pl.pallas_call(
        kernel,
        out_shape=jax.ShapeDtypeStruct((B, 1), jnp.float32),
        grid=grid,
        in_specs=in_specs,
        # Output block revisited across the N axis -> VMEM-resident accumulator
        # pattern; written back to HBM once per B-tile.
        out_specs=pl.BlockSpec((TB, 1), lambda b, n: (b, 0)),
        scratch_shapes=[pltpu.VMEM((TB, lanes), jnp.float32)],
        compiler_params=pltpu.CompilerParams(
            dimension_semantics=("parallel", "arbitrary"),
        ),
    )(*args)

    return out[:, 0]


def sigmoid_bce_loss(inputs, target, mask=None):
    """Pallas equivalent of SigmoidBCELoss.forward for 2D (B, N) inputs."""
    assert inputs.ndim == 2, "kernel implemented for (B, N) inputs"
    assert target.shape == inputs.shape

    if mask is None:
        # 2-input kernel variant: never materialize a ones() mask in HBM.
        out = _sigmoid_bce_call(inputs, target, None, has_mask=False)
    else:
        assert mask.shape == inputs.shape
        m = mask
        if m.dtype == jnp.bool_:
            m = m.astype(jnp.int8)   # keep mask narrow (1 B/elem) in HBM
        out = _sigmoid_bce_call(inputs, target, m, has_mask=True)

    # Match torch dtype semantics of the module output.
    return out.astype(inputs.dtype)


def _reference(inputs, target, mask=None):
    # Pure-JAX reference of
    # F.binary_cross_entropy_with_logits(..., weight=mask, reduction='none').mean(dim=1)
    x = inputs.astype(jnp.float32)
    t = target.astype(jnp.float32)
    loss = jnp.maximum(x, 0.0) - x * t + jnp.log1p(jnp.exp(-jnp.abs(x)))
    if mask is not None:
        loss = loss * mask.astype(jnp.float32)
    return loss.mean(axis=1)


if __name__ == "__main__":
    key = jax.random.PRNGKey(0)
    k1, k2, k3, k4, k5, k6 = jax.random.split(key, 6)

    # Case 1: tiny word2vec-style logits (single-block path), bool mask kept narrow.
    B1, N1 = 2, 8
    x1 = jax.random.normal(k1, (B1, N1), dtype=jnp.float32)
    t1 = (jax.random.uniform(k2, (B1, N1)) > 0.5).astype(jnp.float32)
    m1 = jax.random.uniform(k3, (B1, N1)) > 0.3   # bool mask

    out1 = sigmoid_bce_loss(x1, t1, m1)
    jax.block_until_ready(out1)
    assert out1.shape == (B1,), out1.shape
    assert jnp.allclose(out1, _reference(x1, t1, m1), atol=1e-5, rtol=1e-4)

    out1n = sigmoid_bce_loss(x1, t1)              # mask=None path (2-input kernel)
    jax.block_until_ready(out1n)
    assert jnp.allclose(out1n, _reference(x1, t1), atol=1e-5, rtol=1e-4)

    # Case 2: exercises N-tiling + accumulator + ragged tail (TN=1024 -> 3 N-steps).
    B2, N2 = 4, 2304
    x2 = jax.random.normal(k4, (B2, N2), dtype=jnp.float32)
    t2 = (jax.random.uniform(k5, (B2, N2)) > 0.5).astype(jnp.float32)
    m2 = (jax.random.uniform(k6, (B2, N2)) > 0.3).astype(jnp.float32)

    out2 = sigmoid_bce_loss(x2, t2, m2)
    jax.block_until_ready(out2)
    assert out2.shape == (B2,), out2.shape
    assert jnp.allclose(out2, _reference(x2, t2, m2), atol=1e-5, rtol=1e-4)

    out2n = sigmoid_bce_loss(x2, t2)
    jax.block_until_ready(out2n)
    assert jnp.allclose(out2n, _reference(x2, t2), atol=1e-5, rtol=1e-4)

    print("KERNEL_OK")
</pallas_src>

<mosaic_0001>
module attributes {stable_mosaic.version = 11 : i64} {
  func.func @kernel(%arg0: i32, %arg1: i32, %arg2: memref<2x8xf32, #tpu.memory_space<vmem>>, %arg3: memref<2x8xf32, #tpu.memory_space<vmem>>, %arg4: memref<2x8xi8, #tpu.memory_space<vmem>>, %arg5: memref<2x1xf32, #tpu.memory_space<vmem>>, %arg6: memref<2x1xf32, #tpu.memory_space<vmem>>) attributes {dimension_semantics = [#tpu.dimension_semantics<parallel>, #tpu.dimension_semantics<arbitrary>], iteration_bounds = array<i64: 1, 1>, scalar_prefetch = 0 : i64, scratch_operands = 1 : i64, tpu.core_type = #tpu.core_type<tc>, window_params = [{transform_indices = @transform_0, window_bounds = array<i64: 2, 8>}, {transform_indices = @transform_1, window_bounds = array<i64: 2, 8>}, {transform_indices = @transform_2, window_bounds = array<i64: 2, 8>}, {transform_indices = @transform_3, window_bounds = array<i64: 2, 1>}]} {
    %c0_i32 = arith.constant 0 : i32
    %0 = arith.cmpi eq, %arg1, %c0_i32 : i32
    %1 = arith.extui %0 : i1 to i32
    %c0_i32_0 = arith.constant 0 : i32
    %2 = arith.cmpi ne, %1, %c0_i32_0 : i32
    scf.if %2 {
      %cst_14 = arith.constant 0.000000e+00 : f32
      %26 = vector.broadcast %cst_14 : f32 to vector<2x1xf32>
      %c0_15 = arith.constant 0 : index
      %c0_16 = arith.constant 0 : index
      %27 = vector.load %arg6[%c0_15, %c0_16] : memref<2x1xf32, #tpu.memory_space<vmem>>, vector<2x1xf32>
      tpu.vector_store %arg6[%c0_15, %c0_16], %26 {strides = array<i32>} : memref<2x1xf32, #tpu.memory_space<vmem>>, vector<2x1xf32>,
    } else {
    }
    %c0 = arith.constant 0 : index
    %c0_1 = arith.constant 0 : index
    %3 = vector.load %arg2[%c0, %c0_1] : memref<2x8xf32, #tpu.memory_space<vmem>>, vector<2x8xf32>
    %c0_2 = arith.constant 0 : index
    %c0_3 = arith.constant 0 : index
    %4 = vector.load %arg3[%c0_2, %c0_3] : memref<2x8xf32, #tpu.memory_space<vmem>>, vector<2x8xf32>
    %cst = arith.constant 0.000000e+00 : f32
    %5 = vector.broadcast %cst : f32 to vector<2x8xf32>
    %6 = arith.maximumf %3, %5 : vector<2x8xf32>
    %7 = arith.mulf %3, %4 : vector<2x8xf32>
    %8 = arith.subf %6, %7 : vector<2x8xf32>
    %9 = math.absf %3 : vector<2x8xf32>
    %cst_4 = arith.constant 0.000000e+00 : f32
    %10 = vector.broadcast %cst_4 : f32 to vector<2x8xf32>
    %11 = arith.subf %10, %9 : vector<2x8xf32>
    %12 = math.exp %11 : vector<2x8xf32>
    %13 = math.log1p %12 : vector<2x8xf32>
    %14 = arith.addf %8, %13 : vector<2x8xf32>
    %c0_5 = arith.constant 0 : index
    %c0_6 = arith.constant 0 : index
    %15 = vector.load %arg4[%c0_5, %c0_6] : memref<2x8xi8, #tpu.memory_space<vmem>>, vector<2x8xi8>
    %16 = arith.sitofp %15 : vector<2x8xi8> to vector<2x8xf32>
    %17 = arith.mulf %14, %16 : vector<2x8xf32>
    %c0_7 = arith.constant 0 : index
    %c0_8 = arith.constant 0 : index
    %18 = vector.load %arg6[%c0_7, %c0_8] : memref<2x1xf32, #tpu.memory_space<vmem>>, vector<2x1xf32>
    %cst_9 = arith.constant dense<0.000000e+00> : vector<2xf32>
    %19 = vector.multi_reduction <add>, %17, %cst_9 [1] : vector<2x8xf32> to vector<2xf32>
    %20 = vector.shape_cast %19 : vector<2xf32> to vector<2x1xf32>
    %21 = arith.addf %18, %20 : vector<2x1xf32>
    %c0_10 = arith.constant 0 : index
    %c0_11 = arith.constant 0 : index
    %22 = vector.load %arg6[%c0_10, %c0_11] : memref<2x1xf32, #tpu.memory_space<vmem>>, vector<2x1xf32>
    tpu.vector_store %arg6[%c0_10, %c0_11], %21 {strides = array<i32>} : memref<2x1xf32, #tpu.memory_space<vmem>>, vector<2x1xf32>,
    %c0_i32_12 = arith.constant 0 : i32
    %23 = arith.cmpi eq, %arg1, %c0_i32_12 : i32
    %24 = arith.extui %23 : i1 to i32
    %c0_i32_13 = arith.constant 0 : i32
    %25 = arith.cmpi ne, %24, %c0_i32_13 : i32
    scf.if %25 {
      %c0_14 = arith.constant 0 : index
      %c0_15 = arith.constant 0 : index
      %26 = vector.load %arg6[%c0_14, %c0_15] : memref<2x1xf32, #tpu.memory_space<vmem>>, vector<2x1xf32>
      %cst_16 = arith.constant dense<0.000000e+00> : vector<2xf32>
      %27 = vector.multi_reduction <add>, %26, %cst_16 [1] : vector<2x1xf32> to vector<2xf32>
      %28 = vector.shape_cast %27 : vector<2xf32> to vector<2x1xf32>
      %cst_17 = arith.constant 1.250000e-01 : f32
      %29 = vector.broadcast %cst_17 : f32 to vector<2x1xf32>
      %30 = arith.mulf %28, %29 : vector<2x1xf32>
      %c0_18 = arith.constant 0 : index
      %c0_19 = arith.constant 0 : index
      %31 = vector.load %arg5[%c0_18, %c0_19] : memref<2x1xf32, #tpu.memory_space<vmem>>, vector<2x1xf32>
      tpu.vector_store %arg5[%c0_18, %c0_19], %30 {strides = array<i32>} : memref<2x1xf32, #tpu.memory_space<vmem>>, vector<2x1xf32>,
    } else {
    }
    return
  }
  func.func @transform_0(%arg0: i32, %arg1: i32) -> (i32, i32) {
    %c0_i32 = arith.constant 0 : i32
    return %arg0, %arg1 : i32, i32
  }
  func.func @transform_1(%arg0: i32, %arg1: i32) -> (i32, i32) {
    %c0_i32 = arith.constant 0 : i32
    return %arg0, %arg1 : i32, i32
  }
  func.func @transform_2(%arg0: i32, %arg1: i32) -> (i32, i32) {
    %c0_i32 = arith.constant 0 : i32
    return %arg0, %arg1 : i32, i32
  }
  func.func @transform_3(%arg0: i32, %arg1: i32) -> (i32, i32) {
    %c0_i32 = arith.constant 0 : i32
    %c0_i32_0 = arith.constant 0 : i32
    return %arg0, %c0_i32 : i32, i32
  }
}

</mosaic_0001>

<bundles_post_ra>
// kernel: _sigmoid_bce_call.1
= control target key start
LH: loop header
LB: loop body
LE: loop exit
PB: predicated region body
PF: predicated region fallthrough
CT: control target
= control target key end

     0   :  { %8 = vsyncpa [#allocation4], 0  ;;  %s105_s12 = smov [#allocation3]   ;;  %s151_s0 = inlined_call_operand.hbm [shape: f32[2,8], index: 0, kind: input, shape index: {}]   ;;  %s152_s1 = inlined_call_operand.vmem [shape: f32[2,8], index: 1, kind: input, shape index: {}]   ;;  %s153_s2 = inlined_call_operand.vmem [shape: s8[2,8], index: 2, kind: input, shape index: {}]   ;;  %s154_s3 = inlined_call_operand.vmem [shape: f32[2,1], index: 3, kind: output, shape index: {}]  }
   0x1   :  { %s15_s13 = sshll.u32 %s105_s12, 4  ;;  %s81_s16 = scalar_lea.hbm %s151_s0, 32  ;;  %s16_s13 = int_to_ptr.vmem [resolvable:$true] %s15_s13 }
   0x2   :  { %p82_p0 = scmp.ne.s32.totalorder %s151_s0, %s81_s16  ;;  %p85_p1 = scmp.lt.u32.totalorder %s81_s16, %s151_s0 }
   0x4   :  { %p87_p2 = pnand %p85_p1, %p82_p0 }
   0x6   :  { %90 = shalt.err (!%p87_p2)
}
   0x7   :  { %s91_s21 = scalar_lea.vmem %s16_s13, 32  ;;  %p96_p4 = scmp.lt.s32.totalorder %s16_s13, %s16_s13 }
   0x8   :  { %p92_p3 = scmp.ne.s32.totalorder %s16_s13, %s91_s21  ;;  %p97_p5 = scmp.lt.s32.totalorder %s91_s21, %s91_s21 }
   0xa   :  { %p98_p6 = por %p97_p5, %p96_p4 }
   0xc   :  { %p99_p7 = pnand %p98_p6, %p92_p3 }
   0xe   :  { %102 = shalt.err (!%p99_p7)
}
   0xf   :  { %18 = dma.hbm_to_vmem [thread:$0]  %s151_s0, 32, %s16_s13, [#allocation4]  }
  0x10   :  { %103 = dma.done.wait [#allocation4], 32  }
  0x11   :  { %104 = vsyncadd [#allocation4], 4294967264  ;;  %vm30_vm0 = vcmask 1024   ;;  %v106_v0 = vmov 0.0   ;;  %v32_v1 = vld [vmem:[#allocation3] sm:$0x3] }
  0x12   :  { %31 = vst.msk [vmem:[#allocation2] sm:$0x3] %vm30_vm0, %v106_v0  ;;  %v37_v2 = vand.u32 2147483647, %v32_v1  ;;  %v33_v8 = vld [vmem:[%s152_s1] sm:$0x3] }
  0x13   :  { %v51_v10 = vld [vmem:[%s153_s2] sm:$0x1]  ;;  %v34_v11 = vmax.f32 %v32_v1, 0.0  ;;  %v35_v12 = vmul.f32 %v33_v8, %v32_v1  ;;  %vm56_vm2 = vcmask 58368  }
  0x14   :  { %v38_v3 = vsub.f32 0.0, %v37_v2  ;;  %v52_v14 = vunpack.c.0.s8 %v51_v10 }
  0x15   :  { %v36_v17 = vsub.f32 %v34_v11, %v35_v12 }
  0x16   :  { %v39_v4 = vmul.f32 1.442695, %v38_v3  ;;  %v53_v19 = vcvt.s32.f32 %v52_v14 }
  0x18   :  { %77 = vpow2.f32 %v39_v4 }
  0x19   :  { %v55_v24 = vld [vmem:[#allocation2] sm:$0x3] }
  0x22   :  { %v78_v5 = vpop.eup %77 }
  0x23   :  { %v41_v6 = vadd.f32 1.0, %v78_v5  ;;  %v44_v7 = vmul.f32 -0.5, %v78_v5  ;;  %v47_v13 = vand.u32 2147483647, %v78_v5 }
  0x25   :  { %79 = vlog2.f32 %v41_v6  ;;  %v45_v9 = vadd.f32 1.0, %v44_v7  ;;  %vm48_vm1 = vcmp.lt.f32.partialorder %v47_v13, 0.0004427343 }
  0x27   :  { %v46_v15 = vmul.f32 %v78_v5, %v45_v9 }
  0x2f   :  { %v80_v16 = vpop.eup %79 }
  0x30   :  { %v43_v18 = vmul.f32 0.6931472, %v80_v16 }
  0x32   :  { %v49_v20 = vsel %vm48_vm1, %v46_v15, %v43_v18 }
  0x33   :  { %v50_v21 = vadd.f32 %v49_v20, %v36_v17 }
  0x35   :  { %v54_v22 = vmul.f32 %v53_v19, %v50_v21 }
  0x37   :  { %v57_v23 = vsel %vm56_vm2, %v54_v22, 0.0 }
  0x38   :  { %58 = vadd.xlane.f32.xlu0 %v57_v23 }
  0xc5   :  { %v59_v25 = vpop.xlane.xlu0 %58 }
  0xc6   :  { %v60_v26 = vadd.f32 %v59_v25, %v55_v24 }
  0xc8   :  { %62 = vst.msk [vmem:[#allocation2] sm:$0x3] %vm30_vm0, %v60_v26 }
  0xcf   :  { %v66_v27 = vld [vmem:[#allocation2] sm:$0x3] }
  0xd0   :  { %v68_v28 = vmul.f32 0.125, %v66_v27 }
  0xd2   :  { %69 = vst.msk [vmem:[%s154_s3] sm:$0x3] %vm30_vm0, %v68_v28 }
  0xd3   :  { %74 = vsyncpa [#allocation4], 1 }

</bundles_post_ra>
